<compile_context>
chip_gen: v7x
topology: tpu7x:2x2x1
jax: 0.10.0
libtpu: 0.0.40
codegen_flags: <defaults>
</compile_context>

<pallas_src>
import functools
import math

import jax
import jax.numpy as jnp
from jax.experimental import pallas as pl
from jax.experimental.pallas import tpu as pltpu


def _biasfree_ln_kernel(x_ref, w_ref, o_ref, *, eps):
    # x_ref: (TM, C) row tile, w_ref: (1, C) resident weight, o_ref: (TM, C).
    x = x_ref[...].astype(jnp.float32)
    mean = jnp.mean(x, axis=-1, keepdims=True)
    xc = x - mean
    var = jnp.mean(xc * xc, axis=-1, keepdims=True)        # unbiased=False variance
    inv = jax.lax.rsqrt(var + eps)                         # EUP rsqrt
    w = w_ref[...].astype(jnp.float32)                     # broadcasts over rows
    # Bias-free LN: scale the RAW x (no mean subtraction in the numerator).
    o_ref[...] = (x * inv * w).astype(o_ref.dtype)


def biasfree_layernorm(x, weight, eps=1e-5, max_tile_m=1024):
    """x: (..., C); weight: (C,). Returns the same shape/dtype as x."""
    orig_shape = x.shape
    C = orig_shape[-1]
    assert weight.shape == (C,)
    M = math.prod(orig_shape[:-1]) if len(orig_shape) > 1 else 1

    x2 = x.reshape(M, C)
    w2 = weight.reshape(1, C)

    # Row tile: multiple of 8 (sublane), capped by a ~2 MiB-per-buffer VMEM
    # budget (safe under the 16 MiB v5e scoped default with double buffering
    # of both the input and output tiles), never larger than M rounded to 8.
    bytes_per_row = C * x2.dtype.itemsize
    tm = min(max_tile_m, max(8, (2 * 1024 * 1024) // max(bytes_per_row, 1)))
    tm = max(8, (tm // 8) * 8)
    tm = min(tm, ((M + 7) // 8) * 8)

    Mp = pl.cdiv(M, tm) * tm
    if Mp != M:
        # Zero-padded rows compute harmless finite values; sliced off below.
        x2 = jnp.pad(x2, ((0, Mp - M), (0, 0)))

    cost = pl.CostEstimate(
        flops=6 * M * C,
        transcendentals=M,
        bytes_accessed=(2 * M * C + C) * x2.dtype.itemsize,
    )

    out = pl.pallas_call(
        functools.partial(_biasfree_ln_kernel, eps=eps),
        out_shape=jax.ShapeDtypeStruct((Mp, C), x.dtype),
        grid_spec=pltpu.PrefetchScalarGridSpec(
            num_scalar_prefetch=0,
            grid=(Mp // tm,),
            in_specs=[
                pl.BlockSpec((tm, C), lambda i: (i, 0)),   # pipelined row tiles
                pl.BlockSpec((1, C), lambda i: (0, 0)),    # weight stays resident
            ],
            out_specs=pl.BlockSpec((tm, C), lambda i: (i, 0)),
        ),
        compiler_params=pltpu.CompilerParams(
            dimension_semantics=("parallel",),             # rows independent; 2 TCs on v7x
        ),
        cost_estimate=cost,
    )(x2, w2)

    if Mp != M:
        out = out[:M]
    return out.reshape(orig_shape)


if __name__ == "__main__":
    # Small deterministic shapes: batch=2, seq=8, hidden=32 (normalized_shape=32).
    B, S, C = 2, 8, 32
    key = jax.random.PRNGKey(0)
    kx, kw = jax.random.split(key, 2)
    x = jax.random.normal(kx, (B, S, C), dtype=jnp.float32)
    # Module initializes weight to ones; perturb slightly so the scale is exercised.
    weight = 1.0 + 0.1 * jax.random.normal(kw, (C,), dtype=jnp.float32)

    out = biasfree_layernorm(x, weight)
    out = jax.block_until_ready(out)

    # Reference (exact torch semantics: var(-1, unbiased=False), raw x in numerator).
    mean = jnp.mean(x, axis=-1, keepdims=True)
    var = jnp.mean((x - mean) ** 2, axis=-1, keepdims=True)
    ref = x / jnp.sqrt(var + 1e-5) * weight

    assert out.shape == x.shape
    assert jnp.allclose(out, ref, atol=1e-5, rtol=1e-5)
    print("KERNEL_OK")
</pallas_src>

<mosaic_0001>
module attributes {stable_mosaic.version = 11 : i64} {
  func.func @_biasfree_ln_kernel(%arg0: i32, %arg1: memref<16x32xf32, #tpu.memory_space<vmem>>, %arg2: memref<1x32xf32, #tpu.memory_space<vmem>>, %arg3: memref<16x32xf32, #tpu.memory_space<vmem>>) attributes {dimension_semantics = [#tpu.dimension_semantics<parallel>], iteration_bounds = array<i64: 1>, scalar_prefetch = 0 : i64, scratch_operands = 0 : i64, tpu.core_type = #tpu.core_type<tc>, window_params = [{transform_indices = @transform_0, window_bounds = array<i64: 16, 32>}, {pipeline_mode = #tpu.pipeline_mode<synchronous>, transform_indices = @transform_1, window_bounds = array<i64: 1, 32>}, {transform_indices = @transform_2, window_bounds = array<i64: 16, 32>}]} {
    %c0 = arith.constant 0 : index
    %c0_0 = arith.constant 0 : index
    %0 = vector.load %arg1[%c0, %c0_0] : memref<16x32xf32, #tpu.memory_space<vmem>>, vector<16x32xf32>
    %cst = arith.constant dense<0.000000e+00> : vector<16xf32>
    %1 = vector.multi_reduction <add>, %0, %cst [1] : vector<16x32xf32> to vector<16xf32>
    %2 = vector.shape_cast %1 : vector<16xf32> to vector<16x1xf32>
    %cst_1 = arith.constant 3.200000e+01 : f32
    %3 = vector.broadcast %cst_1 : f32 to vector<16x1xf32>
    %4 = arith.divf %2, %3 : vector<16x1xf32>
    %5 = vector.broadcast %4 : vector<16x1xf32> to vector<16x32xf32>
    %6 = arith.subf %0, %5 : vector<16x32xf32>
    %7 = arith.mulf %6, %6 : vector<16x32xf32>
    %cst_2 = arith.constant dense<0.000000e+00> : vector<16xf32>
    %8 = vector.multi_reduction <add>, %7, %cst_2 [1] : vector<16x32xf32> to vector<16xf32>
    %9 = vector.shape_cast %8 : vector<16xf32> to vector<16x1xf32>
    %cst_3 = arith.constant 3.200000e+01 : f32
    %10 = vector.broadcast %cst_3 : f32 to vector<16x1xf32>
    %11 = arith.divf %9, %10 : vector<16x1xf32>
    %cst_4 = arith.constant 9.99999974E-6 : f32
    %12 = vector.broadcast %cst_4 : f32 to vector<16x1xf32>
    %13 = arith.addf %11, %12 : vector<16x1xf32>
    %14 = math.rsqrt %13 : vector<16x1xf32>
    %c0_5 = arith.constant 0 : index
    %c0_6 = arith.constant 0 : index
    %15 = vector.load %arg2[%c0_5, %c0_6] : memref<1x32xf32, #tpu.memory_space<vmem>>, vector<1x32xf32>
    %16 = vector.broadcast %14 : vector<16x1xf32> to vector<16x32xf32>
    %17 = arith.mulf %0, %16 : vector<16x32xf32>
    %18 = vector.broadcast %15 : vector<1x32xf32> to vector<16x32xf32>
    %19 = arith.mulf %17, %18 : vector<16x32xf32>
    %c0_7 = arith.constant 0 : index
    %c0_8 = arith.constant 0 : index
    %20 = vector.load %arg3[%c0_7, %c0_8] : memref<16x32xf32, #tpu.memory_space<vmem>>, vector<16x32xf32>
    tpu.vector_store %arg3[%c0_7, %c0_8], %19 {strides = array<i32>} : memref<16x32xf32, #tpu.memory_space<vmem>>, vector<16x32xf32>,
    return
  }
  func.func @transform_0(%arg0: i32) -> (i32, i32) {
    %c0_i32 = arith.constant 0 : i32
    %c0_i32_0 = arith.constant 0 : i32
    return %arg0, %c0_i32 : i32, i32
  }
  func.func @transform_1(%arg0: i32) -> (i32, i32) {
    %c0_i32 = arith.constant 0 : i32
    %c0_i32_0 = arith.constant 0 : i32
    %c0_i32_1 = arith.constant 0 : i32
    return %c0_i32, %c0_i32_0 : i32, i32
  }
  func.func @transform_2(%arg0: i32) -> (i32, i32) {
    %c0_i32 = arith.constant 0 : i32
    %c0_i32_0 = arith.constant 0 : i32
    return %arg0, %c0_i32 : i32, i32
  }
}

</mosaic_0001>

<bundles_post_ra>
// kernel: tpu_custom_call.1
= control target key start
LH: loop header
LB: loop body
LE: loop exit
PB: predicated region body
PF: predicated region fallthrough
CT: control target
= control target key end

     0   :  { %7 = vsyncpa [#allocation3], 0  ;;  %s199_s0 = inlined_call_operand.hbm [shape: f32[16,32], index: 0, kind: input, shape index: {}]   ;;  %s200_s1 = inlined_call_operand.vmem [shape: f32[1,32], index: 1, kind: input, shape index: {}]   ;;  %s201_s2 = inlined_call_operand.hbm [shape: f32[16,32], index: 2, kind: output, shape index: {}]  }
   0x1   :  { %8 = vsyncpa [#allocation4], 0  ;;  %s141_s9 = smov [#allocation2]   ;;  %s93_s13 = scalar_lea.hbm %s199_s0, 256 }
   0x2   :  { %s14_s10 = sshll.u32 %s141_s9, 4  ;;  %p94_p0 = scmp.ne.s32.totalorder %s199_s0, %s93_s13  ;;  %s15_s10 = int_to_ptr.vmem [resolvable:$true] %s14_s10 }
   0x3   :  { %p97_p1 = scmp.lt.u32.totalorder %s93_s13, %s199_s0 }
   0x5   :  { %p99_p2 = pnand %p97_p1, %p94_p0 }
   0x7   :  { %102 = shalt.err (!%p99_p2)
}
   0x8   :  { %s103_s18 = scalar_lea.vmem %s15_s10, 256  ;;  %p108_p4 = scmp.lt.s32.totalorder %s15_s10, %s15_s10 }
   0x9   :  { %p104_p3 = scmp.ne.s32.totalorder %s15_s10, %s103_s18  ;;  %p109_p5 = scmp.lt.s32.totalorder %s103_s18, %s103_s18 }
   0xb   :  { %p110_p6 = por %p109_p5, %p108_p4 }
   0xd   :  { %p111_p7 = pnand %p110_p6, %p104_p3 }
   0xf   :  { %114 = shalt.err (!%p111_p7)
}
  0x10   :  { %s142_s19 = smov 128   ;;  %s143_s20 = smov 8  }
  0x11   :  { %20 = dma.hbm_to_vmem [thread:$0]  %s199_s0, 256, %s15_s10, [#allocation3], %s142_s19, %s142_s19, %s143_s20  }
  0x12   :  { %137 = dma.done.wait [#allocation3], 256  }
  0x13   :  { %138 = vsyncadd [#allocation3], 4294967040  ;;  %vm28_vm0 = vcmask 261120   ;;  %v26_v0 = vld [vmem:[#allocation2] sm:$0xff]  ;;  %v27_v1 = vld [vmem:[#allocation2 + $0x8] sm:$0xff]  ;;  %s144_s24 = smov [#allocation5]  }
  0x14   :  { %v29_v2 = vsel %vm28_vm0, %v26_v0, 0.0  ;;  %v32_v3 = vsel %vm28_vm0, %v27_v1, 0.0  ;;  %v84_v21 = vld [vmem:[%s200_s1] ss:$0 sm:$0xff]  ;;  %s72_s25 = sshll.u32 %s144_s24, 4  ;;  %s73_s25 = int_to_ptr.vmem [resolvable:$true] %s72_s25 }
  0x15   :  { %30 = vadd.xlane.f32.xlu0 %v29_v2  ;;  %s115_s26 = scalar_lea.vmem %s73_s25, 256  ;;  %p120_p9 = scmp.lt.s32.totalorder %s73_s25, %s73_s25 }
  0x16   :  { %p116_p8 = scmp.ne.s32.totalorder %s73_s25, %s115_s26  ;;  %p121_p10 = scmp.lt.s32.totalorder %s115_s26, %s115_s26 }
  0x18   :  { %p122_p11 = por %p121_p10, %p120_p9 }
  0x19   :  { %33 = vadd.xlane.f32.xlu0 %v32_v3 }
  0x1a   :  { %p123_p12 = pnand %p122_p11, %p116_p8 }
  0xa2   :  { %v31_v4 = vpop.xlane.xlu0 %30 }
  0xa3   :  { %v36_v5 = vmul.f32 0.03125, %v31_v4 }
  0xa5   :  { %v38_v6 = vsub.f32 %v26_v0, %v36_v5 }
  0xa6   :  { %v34_v7 = vpop.xlane.xlu0 %33 }
  0xa7   :  { %v37_v8 = vmul.f32 0.03125, %v34_v7  ;;  %v40_v9 = vmul.f32 %v38_v6, %v38_v6 }
  0xa9   :  { %v39_v10 = vsub.f32 %v27_v1, %v37_v8  ;;  %v42_v11 = vsel %vm28_vm0, %v40_v9, 0.0 }
  0xaa   :  { %43 = vadd.xlane.f32.xlu1 %v42_v11 }
  0xab   :  { %v41_v12 = vmul.f32 %v39_v10, %v39_v10 }
  0xad   :  { %v45_v13 = vsel %vm28_vm0, %v41_v12, 0.0 }
  0xae   :  { %46 = vadd.xlane.f32.xlu1 %v45_v13 }
 0x137   :  { %v44_v14 = vpop.xlane.xlu1 %43 }
 0x138   :  { %v48_v15 = vmul.f32 0.03125, %v44_v14 }
 0x13a   :  { %v50_v16 = vadd.f32 1e-05, %v48_v15 }
 0x13b   :  { %v47_v17 = vpop.xlane.xlu1 %46 }
 0x13c   :  { %89 = vrsqrt.f32 %v50_v16  ;;  %v49_v18 = vmul.f32 0.03125, %v47_v17 }
 0x13e   :  { %v51_v19 = vadd.f32 1e-05, %v49_v18 }
 0x140   :  { %91 = vrsqrt.f32 %v51_v19 }
 0x146   :  { %v90_v20 = vpop.eup %89 }
 0x147   :  { %v55_v22 = vmul.f32 %v90_v20, %v26_v0 }
 0x149   :  { %v63_v23 = vmul.f32 %v84_v21, %v55_v22 }
 0x14a   :  { %v92_v24 = vpop.eup %91 }
 0x14b   :  { %v56_v25 = vmul.f32 %v92_v24, %v27_v1  ;;  %65 = vst.msk [vmem:[#allocation5] sm:$0xff] %vm28_vm0, %v63_v23 }
 0x14d   :  { %v64_v26 = vmul.f32 %v84_v21, %v56_v25 }
 0x14f   :  { %66 = vst.msk [vmem:[#allocation5 + $0x8] sm:$0xff] %vm28_vm0, %v64_v26 }
 0x150   :  { %126 = shalt.err (!%p123_p12)
}
 0x151   :  { %s127_s28 = scalar_lea.hbm %s201_s2, 256 }
 0x152   :  { %p128_p13 = scmp.ne.s32.totalorder %s201_s2, %s127_s28  ;;  %p131_p0 = scmp.lt.u32.totalorder %s127_s28, %s201_s2 }
 0x154   :  { %p133_p1 = pnand %p131_p0, %p128_p13 }
 0x156   :  { %136 = shalt.err (!%p133_p1)
}
 0x157   :  { %78 = dma.vmem_to_hbm [thread:$0]  %s73_s25, 256, %s201_s2, [#allocation4], %s142_s19, %s142_s19, %s143_s20  }
 0x158   :  { %139 = dma.done.wait [#allocation4], 256  }
 0x159   :  { %140 = vsyncadd [#allocation4], 4294967040 }
 0x15a   :  { %82 = vsyncpa [#allocation3], 1 }
 0x15b   :  { %83 = vsyncpa [#allocation4], 1 }

</bundles_post_ra>
